<compile_context>
chip_gen: v5e
topology: v5e:2x2
jax: 0.10.0
libtpu: 0.0.40
codegen_flags: <defaults>
</compile_context>

<pallas_src>
import functools
import math

import jax
import jax.numpy as jnp
from jax.experimental import pallas as pl
from jax.experimental.pallas import tpu as pltpu


def _round_up(a: int, b: int) -> int:
    return -(-a // b) * b


def _vmem_limit_bytes() -> int:
    """Per-generation scoped-VMEM limit (48 MiB on v7x, 64 MiB on v5e/v6e)."""
    limit = 32 * 1024 * 1024  # safe default if hardware info is unavailable
    try:
        info = pltpu.get_tpu_info()
        cap = getattr(info, "vmem_capacity_bytes", None)
        if cap:
            limit = min(64 * 1024 * 1024, (3 * cap) // 4)
    except Exception:
        pass
    return limit


def _log_l1_kernel(x_ref, y_ref, o_ref, acc_ref, *, steps, tile_rows, width,
                   rows, need_row_mask):
    """Accumulate sum(|log(y) - log(x)|) over this core's slice of row tiles."""
    i = pl.program_id(1)

    @pl.when(i == 0)
    def _():
        acc_ref[...] = jnp.zeros_like(acc_ref)

    x = x_ref[...].astype(jnp.float32)
    y = y_ref[...].astype(jnp.float32)
    diff = jnp.abs(jnp.log(y) - jnp.log(x))

    if need_row_mask:
        # Only the last real tile (partial) and the phantom tile (forced even
        # split) carry invalid rows; a cheap VALU select zeroes them so no
        # padded HBM copies are ever made.
        c = pl.program_id(0)
        g = c * steps + i                       # global tile index
        valid = rows - g * tile_rows            # #real rows in this tile
        row_ids = jax.lax.broadcasted_iota(jnp.int32, (tile_rows, width), 0)
        diff = jnp.where(row_ids < valid, diff, 0.0)

    # VALU-only partial reduce: collapse the vreg-row groups with vector adds
    # into an (8, width) accumulator; the cross-sublane/lane reduce is
    # deferred to the final-step epilogue (keeps XLU out of the per-step path).
    acc_ref[...] += jnp.sum(diff.reshape(tile_rows // 8, 8, width), axis=0)

    @pl.when(i == steps - 1)
    def _():
        total = jnp.sum(acc_ref[...])
        # Lane-dense, tile-aligned (8,128) output block -> unmasked store.
        o_ref[...] = jnp.full((8, 128), total, dtype=jnp.float32)


def log_stft_magnitude_loss(x_mag: jax.Array, y_mag: jax.Array,
                            *, _max_tile_elems: int | None = None) -> jax.Array:
    """Log STFT magnitude loss: mean(|log(y_mag) - log(x_mag)|).

    Args:
      x_mag: (B, frames, freq_bins) magnitude spectrogram of predicted signal.
      y_mag: (B, frames, freq_bins) magnitude spectrogram of ground truth.
      _max_tile_elems: testing hook to force small tiles (exercises the
        multi-tile / partial-tile / phantom-tile paths at tiny shapes).

    Returns:
      Scalar float32 loss.
    """
    assert x_mag.shape == y_mag.shape
    n_elems = math.prod(x_mag.shape)
    freq = x_mag.shape[-1]
    itemsize = jnp.dtype(x_mag.dtype).itemsize

    # Lane-dense layout: free reshape to (rows, width) with width a multiple
    # of 128 when possible; otherwise keep freq as the (full-width) lane dim.
    width = None
    for w in (512, 256, 128):
        if n_elems % w == 0:
            width = w
            break
    if width is None:
        width = freq
    rows = n_elems // width
    x2 = x_mag.reshape(rows, width)
    y2 = y_mag.reshape(rows, width)

    padded_width = _round_up(width, 128)
    vmem_limit = _vmem_limit_bytes()
    # Per-step VMEM model: 2 inputs x 2 pipeline buffers (input dtype) plus up
    # to ~3 tile-sized f32 elementwise temporaries, with 4 MiB headroom.
    bytes_per_elem = 4 * itemsize + 3 * 4
    max_tile_elems = (vmem_limit - 4 * 1024 * 1024) // bytes_per_elem
    if _max_tile_elems is not None:
        max_tile_elems = _max_tile_elems
    max_tile_rows = max(8, (max_tile_elems // padded_width) // 8 * 8)

    # Always produce >= 2 row tiles for any non-trivial input so both v7x
    # TensorCores get work; tile_rows is a multiple of 8.
    if rows > 8:
        tile_rows = min(_round_up(-(-rows // 2), 8), max_tile_rows)
    else:
        tile_rows = 8
    num_tiles = -(-rows // tile_rows)

    split = 2 if num_tiles >= 2 else 1
    steps = -(-num_tiles // split)
    # Row masking is needed if the last tile is partial or a phantom tile was
    # added to even out the two cores' step counts.
    need_row_mask = (rows % tile_rows != 0) or (split * steps != num_tiles)

    def in_map(c, i):
        g = c * steps + i
        return (jnp.minimum(g, num_tiles - 1), 0)   # clamp the phantom tile

    def out_map(c, i):
        return (c, 0)

    kernel = functools.partial(
        _log_l1_kernel, steps=steps, tile_rows=tile_rows, width=width,
        rows=rows, need_row_mask=need_row_mask)

    def run(leading_sem):
        return pl.pallas_call(
            kernel,
            out_shape=jax.ShapeDtypeStruct((split * 8, 128), jnp.float32),
            grid_spec=pltpu.PrefetchScalarGridSpec(
                num_scalar_prefetch=0,
                grid=(split, steps),
                in_specs=[
                    pl.BlockSpec((tile_rows, width), in_map),
                    pl.BlockSpec((tile_rows, width), in_map),
                ],
                out_specs=pl.BlockSpec((8, 128), out_map),
                scratch_shapes=[pltpu.VMEM((8, width), jnp.float32)],
            ),
            compiler_params=pltpu.CompilerParams(
                dimension_semantics=(leading_sem, "arbitrary"),
                vmem_limit_bytes=vmem_limit,
            ),
        )(x2, y2)

    # Prefer CORE_PARALLEL on the leading axis (guarantees 2-TC sharding on
    # v7x); fall back to plain "parallel" if unsupported on this jax/target.
    core_parallel = getattr(pltpu, "CORE_PARALLEL", None)
    if core_parallel is None:
        out = run("parallel")
    else:
        try:
            out = run(core_parallel)
        except Exception:
            out = run("parallel")

    # One partial sum per core slice lives at row c*8, lane 0.
    partials = out[::8, 0]
    return jnp.sum(partials) * jnp.float32(1.0 / n_elems)


if __name__ == "__main__":
    key = jax.random.PRNGKey(0)

    def ref_loss(x, y):
        xf = x.astype(jnp.float32)
        yf = y.astype(jnp.float32)
        return jnp.mean(jnp.abs(jnp.log(yf) - jnp.log(xf)))

    # (shape, dtype, forced max tile elems) — the forced-tile cases exercise
    # the multi-tile, partial-last-tile and phantom-tile (odd tile count)
    # code paths at small shapes.
    cases = [
        ((2, 16, 128), jnp.float32, None),      # baseline single tile
        ((2, 16, 65),  jnp.float32, None),      # odd freq_bins (full-width lane blocks)
        ((2, 50, 128), jnp.float32, 8 * 512),   # multi-tile + partial last tile
        ((1, 17, 512), jnp.float32, 8 * 512),   # odd tile count -> phantom tile
        ((2, 16, 128), jnp.bfloat16, None),     # bf16 inputs (half HBM traffic)
    ]

    for idx, (shape, dtype, mte) in enumerate(cases):
        kx, ky = jax.random.split(jax.random.fold_in(key, idx))
        # Magnitudes must be strictly positive for log(), as in the PyTorch usage.
        x = jnp.exp(jax.random.normal(kx, shape, dtype=jnp.float32)).astype(dtype)
        y = jnp.exp(jax.random.normal(ky, shape, dtype=jnp.float32)).astype(dtype)

        loss = jax.block_until_ready(
            log_stft_magnitude_loss(x, y, _max_tile_elems=mte))
        ref = ref_loss(x, y)
        assert jnp.allclose(loss, ref, rtol=1e-5, atol=1e-5), (shape, dtype, loss, ref)

    print("KERNEL_OK")
</pallas_src>

<mosaic_0001>
module attributes {stable_mosaic.version = 11 : i64} {
  func.func @_log_l1_kernel(%arg0: i32, %arg1: i32, %arg2: memref<8x512xf32, #tpu.memory_space<vmem>>, %arg3: memref<8x512xf32, #tpu.memory_space<vmem>>, %arg4: memref<8x128xf32, #tpu.memory_space<vmem>>, %arg5: memref<8x512xf32, #tpu.memory_space<vmem>>) attributes {dimension_semantics = [#tpu.dimension_semantics<core_parallel>, #tpu.dimension_semantics<arbitrary>], iteration_bounds = array<i64: 1, 1>, scalar_prefetch = 0 : i64, scratch_operands = 1 : i64, tpu.core_type = #tpu.core_type<tc>, window_params = [{transform_indices = @transform_0, window_bounds = array<i64: 8, 512>}, {transform_indices = @transform_1, window_bounds = array<i64: 8, 512>}, {transform_indices = @transform_2, window_bounds = array<i64: 8, 128>}]} {
    %c0_i32 = arith.constant 0 : i32
    %0 = arith.cmpi eq, %arg1, %c0_i32 : i32
    %1 = arith.extui %0 : i1 to i32
    %c0_i32_0 = arith.constant 0 : i32
    %2 = arith.cmpi ne, %1, %c0_i32_0 : i32
    scf.if %2 {
      %cst_10 = arith.constant 0.000000e+00 : f32
      %17 = vector.broadcast %cst_10 : f32 to vector<8x512xf32>
      %c0_11 = arith.constant 0 : index
      %c0_12 = arith.constant 0 : index
      %18 = vector.load %arg5[%c0_11, %c0_12] : memref<8x512xf32, #tpu.memory_space<vmem>>, vector<8x512xf32>
      tpu.vector_store %arg5[%c0_11, %c0_12], %17 {strides = array<i32>} : memref<8x512xf32, #tpu.memory_space<vmem>>, vector<8x512xf32>,
    } else {
    }
    %c0 = arith.constant 0 : index
    %c0_1 = arith.constant 0 : index
    %3 = vector.load %arg2[%c0, %c0_1] : memref<8x512xf32, #tpu.memory_space<vmem>>, vector<8x512xf32>
    %c0_2 = arith.constant 0 : index
    %c0_3 = arith.constant 0 : index
    %4 = vector.load %arg3[%c0_2, %c0_3] : memref<8x512xf32, #tpu.memory_space<vmem>>, vector<8x512xf32>
    %5 = math.log %4 : vector<8x512xf32>
    %6 = math.log %3 : vector<8x512xf32>
    %7 = arith.subf %5, %6 : vector<8x512xf32>
    %8 = math.absf %7 : vector<8x512xf32>
    %c0_4 = arith.constant 0 : index
    %c0_5 = arith.constant 0 : index
    %9 = vector.load %arg5[%c0_4, %c0_5] : memref<8x512xf32, #tpu.memory_space<vmem>>, vector<8x512xf32>
    %10 = vector.shape_cast %8 : vector<8x512xf32> to vector<1x8x512xf32>
    %cst = arith.constant dense<0.000000e+00> : vector<8x512xf32>
    %11 = vector.multi_reduction <add>, %10, %cst [0] : vector<1x8x512xf32> to vector<8x512xf32>
    %12 = arith.addf %9, %11 : vector<8x512xf32>
    %c0_6 = arith.constant 0 : index
    %c0_7 = arith.constant 0 : index
    %13 = vector.load %arg5[%c0_6, %c0_7] : memref<8x512xf32, #tpu.memory_space<vmem>>, vector<8x512xf32>
    tpu.vector_store %arg5[%c0_6, %c0_7], %12 {strides = array<i32>} : memref<8x512xf32, #tpu.memory_space<vmem>>, vector<8x512xf32>,
    %c0_i32_8 = arith.constant 0 : i32
    %14 = arith.cmpi eq, %arg1, %c0_i32_8 : i32
    %15 = arith.extui %14 : i1 to i32
    %c0_i32_9 = arith.constant 0 : i32
    %16 = arith.cmpi ne, %15, %c0_i32_9 : i32
    scf.if %16 {
      %c0_10 = arith.constant 0 : index
      %c0_11 = arith.constant 0 : index
      %17 = vector.load %arg5[%c0_10, %c0_11] : memref<8x512xf32, #tpu.memory_space<vmem>>, vector<8x512xf32>
      %18 = vector.shape_cast %17 : vector<8x512xf32> to vector<1x8x512xf32>
      %cst_12 = arith.constant dense<0.000000e+00> : vector<1xf32>
      %19 = vector.multi_reduction <add>, %18, %cst_12 [1, 2] : vector<1x8x512xf32> to vector<1xf32>
      %20 = vector.shape_cast %19 : vector<1xf32> to vector<1x1x1xf32>
      %21 = vector.extract %20[0, 0, 0] : f32 from vector<1x1x1xf32>
      %22 = vector.broadcast %21 : f32 to vector<8x128xf32>
      %c0_13 = arith.constant 0 : index
      %c0_14 = arith.constant 0 : index
      %23 = vector.load %arg4[%c0_13, %c0_14] : memref<8x128xf32, #tpu.memory_space<vmem>>, vector<8x128xf32>
      tpu.vector_store %arg4[%c0_13, %c0_14], %22 {strides = array<i32>} : memref<8x128xf32, #tpu.memory_space<vmem>>, vector<8x128xf32>,
    } else {
    }
    return
  }
  func.func @transform_0(%arg0: i32, %arg1: i32) -> (i32, i32) {
    %c1_i32 = arith.constant 1 : i32
    %0 = arith.muli %arg0, %c1_i32 : i32
    %1 = arith.addi %0, %arg1 : i32
    %c0_i32 = arith.constant 0 : i32
    %2 = arith.minsi %1, %c0_i32 : i32
    %c0_i32_0 = arith.constant 0 : i32
    %c0_i32_1 = arith.constant 0 : i32
    return %2, %c0_i32_0 : i32, i32
  }
  func.func @transform_1(%arg0: i32, %arg1: i32) -> (i32, i32) {
    %c1_i32 = arith.constant 1 : i32
    %0 = arith.muli %arg0, %c1_i32 : i32
    %1 = arith.addi %0, %arg1 : i32
    %c0_i32 = arith.constant 0 : i32
    %2 = arith.minsi %1, %c0_i32 : i32
    %c0_i32_0 = arith.constant 0 : i32
    %c0_i32_1 = arith.constant 0 : i32
    return %2, %c0_i32_0 : i32, i32
  }
  func.func @transform_2(%arg0: i32, %arg1: i32) -> (i32, i32) {
    %c0_i32 = arith.constant 0 : i32
    %c0_i32_0 = arith.constant 0 : i32
    return %arg0, %c0_i32 : i32, i32
  }
}

module attributes {stable_mosaic.version = 11 : i64} {
  func.func @_log_l1_kernel(%arg0: i32, %arg1: i32, %arg2: memref<8x512xf32, #tpu.memory_space<vmem>>, %arg3: memref<8x512xf32, #tpu.memory_space<vmem>>, %arg4: memref<8x128xf32, #tpu.memory_space<vmem>>, %arg5: memref<8x512xf32, #tpu.memory_space<vmem>>) attributes {dimension_semantics = [#tpu.dimension_semantics<parallel>, #tpu.dimension_semantics<arbitrary>], iteration_bounds = array<i64: 1, 1>, scalar_prefetch = 0 : i64, scratch_operands = 1 : i64, tpu.core_type = #tpu.core_type<tc>, window_params = [{transform_indices = @transform_0, window_bounds = array<i64: 8, 512>}, {transform_indices = @transform_1, window_bounds = array<i64: 8, 512>}, {transform_indices = @transform_2, window_bounds = array<i64: 8, 128>}]} {
    %c0_i32 = arith.constant 0 : i32
    %0 = arith.cmpi eq, %arg1, %c0_i32 : i32
    %1 = arith.extui %0 : i1 to i32
    %c0_i32_0 = arith.constant 0 : i32
    %2 = arith.cmpi ne, %1, %c0_i32_0 : i32
    scf.if %2 {
      %cst_10 = arith.constant 0.000000e+00 : f32
      %17 = vector.broadcast %cst_10 : f32 to vector<8x512xf32>
      %c0_11 = arith.constant 0 : index
      %c0_12 = arith.constant 0 : index
      %18 = vector.load %arg5[%c0_11, %c0_12] : memref<8x512xf32, #tpu.memory_space<vmem>>, vector<8x512xf32>
      tpu.vector_store %arg5[%c0_11, %c0_12], %17 {strides = array<i32>} : memref<8x512xf32, #tpu.memory_space<vmem>>, vector<8x512xf32>,
    } else {
    }
    %c0 = arith.constant 0 : index
    %c0_1 = arith.constant 0 : index
    %3 = vector.load %arg2[%c0, %c0_1] : memref<8x512xf32, #tpu.memory_space<vmem>>, vector<8x512xf32>
    %c0_2 = arith.constant 0 : index
    %c0_3 = arith.constant 0 : index
    %4 = vector.load %arg3[%c0_2, %c0_3] : memref<8x512xf32, #tpu.memory_space<vmem>>, vector<8x512xf32>
    %5 = math.log %4 : vector<8x512xf32>
    %6 = math.log %3 : vector<8x512xf32>
    %7 = arith.subf %5, %6 : vector<8x512xf32>
    %8 = math.absf %7 : vector<8x512xf32>
    %c0_4 = arith.constant 0 : index
    %c0_5 = arith.constant 0 : index
    %9 = vector.load %arg5[%c0_4, %c0_5] : memref<8x512xf32, #tpu.memory_space<vmem>>, vector<8x512xf32>
    %10 = vector.shape_cast %8 : vector<8x512xf32> to vector<1x8x512xf32>
    %cst = arith.constant dense<0.000000e+00> : vector<8x512xf32>
    %11 = vector.multi_reduction <add>, %10, %cst [0] : vector<1x8x512xf32> to vector<8x512xf32>
    %12 = arith.addf %9, %11 : vector<8x512xf32>
    %c0_6 = arith.constant 0 : index
    %c0_7 = arith.constant 0 : index
    %13 = vector.load %arg5[%c0_6, %c0_7] : memref<8x512xf32, #tpu.memory_space<vmem>>, vector<8x512xf32>
    tpu.vector_store %arg5[%c0_6, %c0_7], %12 {strides = array<i32>} : memref<8x512xf32, #tpu.memory_space<vmem>>, vector<8x512xf32>,
    %c0_i32_8 = arith.constant 0 : i32
    %14 = arith.cmpi eq, %arg1, %c0_i32_8 : i32
    %15 = arith.extui %14 : i1 to i32
    %c0_i32_9 = arith.constant 0 : i32
    %16 = arith.cmpi ne, %15, %c0_i32_9 : i32
    scf.if %16 {
      %c0_10 = arith.constant 0 : index
      %c0_11 = arith.constant 0 : index
      %17 = vector.load %arg5[%c0_10, %c0_11] : memref<8x512xf32, #tpu.memory_space<vmem>>, vector<8x512xf32>
      %18 = vector.shape_cast %17 : vector<8x512xf32> to vector<1x8x512xf32>
      %cst_12 = arith.constant dense<0.000000e+00> : vector<1xf32>
      %19 = vector.multi_reduction <add>, %18, %cst_12 [1, 2] : vector<1x8x512xf32> to vector<1xf32>
      %20 = vector.shape_cast %19 : vector<1xf32> to vector<1x1x1xf32>
      %21 = vector.extract %20[0, 0, 0] : f32 from vector<1x1x1xf32>
      %22 = vector.broadcast %21 : f32 to vector<8x128xf32>
      %c0_13 = arith.constant 0 : index
      %c0_14 = arith.constant 0 : index
      %23 = vector.load %arg4[%c0_13, %c0_14] : memref<8x128xf32, #tpu.memory_space<vmem>>, vector<8x128xf32>
      tpu.vector_store %arg4[%c0_13, %c0_14], %22 {strides = array<i32>} : memref<8x128xf32, #tpu.memory_space<vmem>>, vector<8x128xf32>,
    } else {
    }
    return
  }
  func.func @transform_0(%arg0: i32, %arg1: i32) -> (i32, i32) {
    %c1_i32 = arith.constant 1 : i32
    %0 = arith.muli %arg0, %c1_i32 : i32
    %1 = arith.addi %0, %arg1 : i32
    %c0_i32 = arith.constant 0 : i32
    %2 = arith.minsi %1, %c0_i32 : i32
    %c0_i32_0 = arith.constant 0 : i32
    %c0_i32_1 = arith.constant 0 : i32
    return %2, %c0_i32_0 : i32, i32
  }
  func.func @transform_1(%arg0: i32, %arg1: i32) -> (i32, i32) {
    %c1_i32 = arith.constant 1 : i32
    %0 = arith.muli %arg0, %c1_i32 : i32
    %1 = arith.addi %0, %arg1 : i32
    %c0_i32 = arith.constant 0 : i32
    %2 = arith.minsi %1, %c0_i32 : i32
    %c0_i32_0 = arith.constant 0 : i32
    %c0_i32_1 = arith.constant 0 : i32
    return %2, %c0_i32_0 : i32, i32
  }
  func.func @transform_2(%arg0: i32, %arg1: i32) -> (i32, i32) {
    %c0_i32 = arith.constant 0 : i32
    %c0_i32_0 = arith.constant 0 : i32
    return %arg0, %c0_i32 : i32, i32
  }
}

</mosaic_0001>

<bundles_post_ra>
// kernel: tpu_custom_call.1
= control target key start
LH: loop header
LB: loop body
LE: loop exit
PB: predicated region body
PF: predicated region fallthrough
CT: control target
= control target key end

     0   :  { %s285_s9 = sld [smem:[#allocation0]]   ;;  %s300_s0 = inlined_call_operand.hbm [shape: f32[8,512], index: 0, kind: input, shape index: {}]   ;;  %s301_s1 = inlined_call_operand.hbm [shape: f32[8,512], index: 1, kind: input, shape index: {}]   ;;  %s302_s2 = inlined_call_operand.hbm [shape: f32[8,128], index: 2, kind: output, shape index: {}]  }
   0x1   :  { %7 = vsyncpa [#allocation4], 0 }
   0x2   :  { %8 = vsyncpa [#allocation7], 0 }
   0x3   :  { %9 = vsyncpa [#allocation5], 0  ;;  %s267_s10 = smov [#allocation3]   ;;  %s21_s14 = sshll.u32 %s300_s0, 4  ;;  %s22_s14 = int_to_ptr.hbm [resolvable:$true] %s21_s14 }
   0x4   :  { %s23_s11 = sshll.u32 %s267_s10, 4  ;;  %s38_s17 = sshll.u32 %s301_s1, 4  ;;  %s24_s11 = int_to_ptr.vmem [resolvable:$true] %s23_s11  ;;  %s39_s17 = int_to_ptr.hbm [resolvable:$true] %s38_s17 }
   0x5   :  { %26 = dma.hbm_to_vmem [thread:$0]  %s22_s14, 512, %s24_s11, [#allocation4]  }
   0x6   :  { %s268_s18 = smov [#allocation6]  }
   0x7   :  { %s40_s19 = sshll.u32 %s268_s18, 4  ;;  %s41_s19 = int_to_ptr.vmem [resolvable:$true] %s40_s19 }
   0x8   :  { %43 = dma.hbm_to_vmem [thread:$0]  %s39_s17, 512, %s41_s19, [#allocation7]  }
   0x9   :  { %261 = dma.done.wait [#allocation4], 512  }
   0xa   :  { %262 = vsyncadd [#allocation4], 4294966784 }
   0xb   :  { %263 = dma.done.wait [#allocation7], 512  }
   0xc   :  { %264 = vsyncadd [#allocation7], 4294966784  ;;  %v66_v0 = vld [vmem:[#allocation3] sm:$0xff]  ;;  %v71_v2 = vld [vmem:[#allocation6 + $0x8] sm:$0xff]  ;;  %s165_s0 = sshll.u32 %s285_s9, 3  ;;  %s269_s22 = smov [#allocation8]  }
   0xd   :  { %v70_v1 = vld [vmem:[#allocation6] sm:$0xff]  ;;  %173 = vlog2.f32 %v66_v0  ;;  %v72_v3 = vld [vmem:[#allocation6 + $0x10] sm:$0xff]  ;;  %v73_v4 = vld [vmem:[#allocation6 + $0x18] sm:$0xff]  ;;  %s140_s21 = scalar_lea.hbm %s302_s2, %s165_s0  ;;  %s142_s23 = sshll.u32 %s269_s22, 4  ;;  %s143_s23 = int_to_ptr.vmem [resolvable:$true] %s142_s23 }
   0xe   :  { %175 = vlog2.f32 %v70_v1  ;;  %v67_v5 = vld [vmem:[#allocation3 + $0x8] sm:$0xff]  ;;  %v68_v6 = vld [vmem:[#allocation3 + $0x10] sm:$0xff]  ;;  %v69_v7 = vld [vmem:[#allocation3 + $0x18] sm:$0xff]  ;;  %s144_s24 = sshll.u32 %s140_s21, 4  ;;  %s253_s30 = scalar_lea.hbm %s302_s2, 8  ;;  %s145_s24 = int_to_ptr.hbm [resolvable:$true] %s144_s24 }
   0xf   :  { %177 = vlog2.f32 %v71_v2  ;;  %s249_s26 = sshra.s32 %s145_s24, 4  ;;  %s250_s26 = int_to_ptr.hbm [resolvable:$true] %s249_s26 }
  0x10   :  { %179 = vlog2.f32 %v72_v3  ;;  %s251_s27 = scalar_lea.hbm %s250_s26, 8 }
  0x11   :  { %181 = vlog2.f32 %v73_v4  ;;  %p252_p0 = scmp.ne.s32.totalorder %s250_s26, %s251_s27  ;;  %p255_p1 = scmp.lt.s32.totalorder %s253_s30, %s251_s27 }
  0x12   :  { %183 = vlog2.f32 %v67_v5 }
  0x13   :  { %v174_v8 = vpop.eup %173  ;;  %185 = vlog2.f32 %v68_v6  ;;  %p257_p2 = pnand %p255_p1, %p252_p0 }
  0x14   :  { %v176_v9 = vpop.eup %175  ;;  %v83_v10 = vmul.f32 0.6931472, %v174_v8  ;;  %187 = vlog2.f32 %v69_v7 }
  0x15   :  { %v178_v11 = vpop.eup %177  ;;  %v75_v12 = vmul.f32 0.6931472, %v176_v9 }
  0x16   :  { %v180_v13 = vpop.eup %179  ;;  %v77_v15 = vmul.f32 0.6931472, %v178_v11 }
  0x17   :  { %v182_v14 = vpop.eup %181  ;;  %v90_v16 = vsub.f32 %v75_v12, %v83_v10  ;;  %v79_v18 = vmul.f32 0.6931472, %v180_v13 }
  0x18   :  { %v184_v17 = vpop.eup %183  ;;  %v81_v20 = vmul.f32 0.6931472, %v182_v14 }
  0x19   :  { %v186_v19 = vpop.eup %185  ;;  %v85_v21 = vmul.f32 0.6931472, %v184_v17  ;;  %v94_v26 = vand.u32 2147483647, %v90_v16 }
  0x1a   :  { %v188_v22 = vpop.eup %187  ;;  %v87_v23 = vmul.f32 0.6931472, %v186_v19 }
  0x1b   :  { %v89_v24 = vmul.f32 0.6931472, %v188_v22  ;;  %v91_v25 = vsub.f32 %v77_v15, %v85_v21 }
  0x1c   :  { %v92_v27 = vsub.f32 %v79_v18, %v87_v23 }
  0x1d   :  { %v93_v28 = vsub.f32 %v81_v20, %v89_v24  ;;  %v95_v29 = vand.u32 2147483647, %v91_v25 }
  0x1e   :  { %v96_v30 = vand.u32 2147483647, %v92_v27 }
  0x1f   :  { %v97_v31 = vand.u32 2147483647, %v93_v28  ;;  %v121_v32 = vadd.f32 %v95_v29, %v94_v26 }
  0x21   :  { %v122_v33 = vadd.f32 %v121_v32, %v96_v30 }
  0x23   :  { %v123_v34 = vadd.f32 %v122_v33, %v97_v31 }
  0x25   :  { %124 = vadd.xlane.f32.xlu0 %v123_v34 }
  0x98   :  { %v125_v35 = vpop.xlane.xlu0 %124 }
  0x99   :  { %v126_v36 = vrot.slane %v125_v35, 4 }
  0x9b   :  { %v127_v37 = vadd.f32 %v126_v36, %v125_v35 }
  0x9d   :  { %v128_v38 = vrot.slane %v127_v37, 2 }
  0x9f   :  { %v129_v39 = vadd.f32 %v128_v38, %v127_v37 }
  0xa1   :  { %v130_v40 = vrot.slane %v129_v39, 1 }
  0xa3   :  { %v131_v41 = vadd.f32 %v130_v40, %v129_v39 }
  0xa5   :  { %168 = vpush %v131_v41 }
  0xd6   :  { %s169_s25 = spop %168 }
  0xd7   :  { %v133_v42 = vstv %s169_s25 }
  0xd8   :  { %134 = vst [vmem:[#allocation8] sm:$0xff] %v133_v42 }
  0xd9   :  { %260 = shalt.err (!%p257_p2)
}
  0xda   :  { %147 = dma.vmem_to_hbm [thread:$0]  %s143_s23, 128, %s145_s24, [#allocation5]  }
  0xdb   :  { %265 = dma.done.wait [#allocation5], 128  }
  0xdc   :  { %266 = vsyncadd [#allocation5], 4294967168 }
  0xdd   :  { %152 = vsyncpa [#allocation4], 1 }
  0xde   :  { %153 = vsyncpa [#allocation7], 1 }
  0xdf   :  { %154 = vsyncpa [#allocation5], 1 }

// kernel: tpu_custom_call.1
= control target key start
LH: loop header
LB: loop body
LE: loop exit
PB: predicated region body
PF: predicated region fallthrough
CT: control target
= control target key end

     0   :  { %7 = vsyncpa [#allocation4], 0  ;;  %s283_s0 = inlined_call_operand.hbm [shape: f32[8,512], index: 0, kind: input, shape index: {}]   ;;  %s284_s1 = inlined_call_operand.hbm [shape: f32[8,512], index: 1, kind: input, shape index: {}]   ;;  %s285_s2 = inlined_call_operand.hbm [shape: f32[8,128], index: 2, kind: output, shape index: {}]  }
   0x1   :  { %8 = vsyncpa [#allocation7], 0 }
   0x2   :  { %9 = vsyncpa [#allocation5], 0  ;;  %s21_s11 = sshll.u32 %s283_s0, 4  ;;  %s256_s12 = smov [#allocation3]   ;;  %s22_s11 = int_to_ptr.hbm [resolvable:$true] %s21_s11 }
   0x3   :  { %s23_s13 = sshll.u32 %s256_s12, 4  ;;  %s38_s16 = sshll.u32 %s284_s1, 4  ;;  %s24_s13 = int_to_ptr.vmem [resolvable:$true] %s23_s13  ;;  %s39_s16 = int_to_ptr.hbm [resolvable:$true] %s38_s16 }
   0x4   :  { %26 = dma.hbm_to_vmem [thread:$0]  %s22_s11, 512, %s24_s13, [#allocation4]  }
   0x5   :  { %s257_s17 = smov [#allocation6]  }
   0x6   :  { %s40_s18 = sshll.u32 %s257_s17, 4  ;;  %s41_s18 = int_to_ptr.vmem [resolvable:$true] %s40_s18 }
   0x7   :  { %43 = dma.hbm_to_vmem [thread:$0]  %s39_s16, 512, %s41_s18, [#allocation7]  }
   0x8   :  { %250 = dma.done.wait [#allocation4], 512  }
   0x9   :  { %251 = vsyncadd [#allocation4], 4294966784 }
   0xa   :  { %252 = dma.done.wait [#allocation7], 512  }
   0xb   :  { %253 = vsyncadd [#allocation7], 4294966784  ;;  %v66_v0 = vld [vmem:[#allocation3] sm:$0xff]  ;;  %v71_v2 = vld [vmem:[#allocation6 + $0x8] sm:$0xff]  ;;  %s258_s0 = smov [#allocation8]   ;;  %s142_s21 = sshll.u32 %s285_s2, 4  ;;  %s143_s21 = int_to_ptr.hbm [resolvable:$true] %s142_s21 }
   0xc   :  { %v70_v1 = vld [vmem:[#allocation6] sm:$0xff]  ;;  %162 = vlog2.f32 %v66_v0  ;;  %v72_v3 = vld [vmem:[#allocation6 + $0x10] sm:$0xff]  ;;  %v73_v4 = vld [vmem:[#allocation6 + $0x18] sm:$0xff]  ;;  %s140_s1 = sshll.u32 %s258_s0, 4  ;;  %s141_s1 = int_to_ptr.vmem [resolvable:$true] %s140_s1 }
   0xd   :  { %164 = vlog2.f32 %v70_v1  ;;  %v67_v5 = vld [vmem:[#allocation3 + $0x8] sm:$0xff]  ;;  %v68_v6 = vld [vmem:[#allocation3 + $0x10] sm:$0xff]  ;;  %v69_v7 = vld [vmem:[#allocation3 + $0x18] sm:$0xff] }
   0xe   :  { %166 = vlog2.f32 %v71_v2 }
   0xf   :  { %168 = vlog2.f32 %v72_v3 }
  0x10   :  { %170 = vlog2.f32 %v73_v4 }
  0x11   :  { %172 = vlog2.f32 %v67_v5 }
  0x12   :  { %v163_v8 = vpop.eup %162  ;;  %174 = vlog2.f32 %v68_v6 }
  0x13   :  { %v165_v9 = vpop.eup %164  ;;  %v83_v10 = vmul.f32 0.6931472, %v163_v8  ;;  %176 = vlog2.f32 %v69_v7 }
  0x14   :  { %v167_v11 = vpop.eup %166  ;;  %v75_v12 = vmul.f32 0.6931472, %v165_v9 }
  0x15   :  { %v169_v13 = vpop.eup %168  ;;  %v77_v15 = vmul.f32 0.6931472, %v167_v11 }
  0x16   :  { %v171_v14 = vpop.eup %170  ;;  %v90_v16 = vsub.f32 %v75_v12, %v83_v10  ;;  %v79_v18 = vmul.f32 0.6931472, %v169_v13 }
  0x17   :  { %v173_v17 = vpop.eup %172  ;;  %v81_v20 = vmul.f32 0.6931472, %v171_v14 }
  0x18   :  { %v175_v19 = vpop.eup %174  ;;  %v85_v21 = vmul.f32 0.6931472, %v173_v17  ;;  %v94_v26 = vand.u32 2147483647, %v90_v16 }
  0x19   :  { %v177_v22 = vpop.eup %176  ;;  %v87_v23 = vmul.f32 0.6931472, %v175_v19 }
  0x1a   :  { %v89_v24 = vmul.f32 0.6931472, %v177_v22  ;;  %v91_v25 = vsub.f32 %v77_v15, %v85_v21 }
  0x1b   :  { %v92_v27 = vsub.f32 %v79_v18, %v87_v23 }
  0x1c   :  { %v93_v28 = vsub.f32 %v81_v20, %v89_v24  ;;  %v95_v29 = vand.u32 2147483647, %v91_v25 }
  0x1d   :  { %v96_v30 = vand.u32 2147483647, %v92_v27 }
  0x1e   :  { %v97_v31 = vand.u32 2147483647, %v93_v28  ;;  %v121_v32 = vadd.f32 %v95_v29, %v94_v26 }
  0x20   :  { %v122_v33 = vadd.f32 %v121_v32, %v96_v30 }
  0x22   :  { %v123_v34 = vadd.f32 %v122_v33, %v97_v31 }
  0x24   :  { %124 = vadd.xlane.f32.xlu0 %v123_v34 }
  0x97   :  { %v125_v35 = vpop.xlane.xlu0 %124 }
  0x98   :  { %v126_v36 = vrot.slane %v125_v35, 4 }
  0x9a   :  { %v127_v37 = vadd.f32 %v126_v36, %v125_v35 }
  0x9c   :  { %v128_v38 = vrot.slane %v127_v37, 2 }
  0x9e   :  { %v129_v39 = vadd.f32 %v128_v38, %v127_v37 }
  0xa0   :  { %v130_v40 = vrot.slane %v129_v39, 1 }
  0xa2   :  { %v131_v41 = vadd.f32 %v130_v40, %v129_v39 }
  0xa4   :  { %157 = vpush %v131_v41 }
  0xd5   :  { %s158_s22 = spop %157 }
  0xd6   :  { %v133_v42 = vstv %s158_s22 }
  0xd7   :  { %134 = vst [vmem:[#allocation8] sm:$0xff] %v133_v42 }
  0xd8   :  { %145 = dma.vmem_to_hbm [thread:$0]  %s141_s1, 128, %s143_s21, [#allocation5]  }
  0xd9   :  { %254 = dma.done.wait [#allocation5], 128  }
  0xda   :  { %255 = vsyncadd [#allocation5], 4294967168 }
  0xdb   :  { %150 = vsyncpa [#allocation4], 1 }
  0xdc   :  { %151 = vsyncpa [#allocation7], 1 }
  0xdd   :  { %152 = vsyncpa [#allocation5], 1 }

</bundles_post_ra>
